<compile_context>
chip_gen: v5e
topology: v5e:2x2
jax: 0.10.0
libtpu: 0.0.40
codegen_flags: <defaults>
</compile_context>

<pallas_src>
import jax
import jax.numpy as jnp
from jax.experimental import pallas as pl
from jax.experimental.pallas import tpu as pltpu

HIDDEN = 10   # hidden width of net1 / input width of net2
LANES = 128   # TPU vreg lane count; batch maps onto this (fast) axis


def mlp_kernel(x_ref, w1_ref, b1_ref, w2_ref, b2_ref, o_ref):
    # x_ref:          (tile_rows, 128) f32 VMEM tile, batch elements on the lane axis
    # w1/b1/w2_ref:   (10,) f32 in SMEM;  b2_ref: (1,) f32 in SMEM (scalar path)
    x = x_ref[...]
    acc = jnp.full_like(x, b2_ref[0])                         # net2 bias folded into init
    for j in range(HIDDEN):                                   # unrolled: pure VPU work
        h = jnp.maximum(x * w1_ref[j] + b1_ref[j], 0.0)       # net1 row j + ReLU
        acc = acc + h * w2_ref[j]                             # net2 contraction
    o_ref[...] = acc                                          # f32 -> f32, no cast needed


def _choose_tiling(rows_needed, max_tile_rows, target_grid_steps):
    """Pick (tile_rows, grid_steps): tile_rows multiple of 8, grid >= target steps
    for large batches (v7x two-TC balance), and minimal edge-tile padding."""
    steps = max(1, min(pl.cdiv(rows_needed, 8),
                       max(target_grid_steps, pl.cdiv(rows_needed, max_tile_rows))))
    tile_rows = pl.cdiv(pl.cdiv(rows_needed, steps), 8) * 8
    steps = pl.cdiv(rows_needed, tile_rows)
    return tile_rows, steps


def toy_model_forward(x, w1, b1, w2, b2, *, max_tile_rows=4096, target_grid_steps=4):
    """x: (B, 1) f32 -> (B, 1) f32, computing net2(relu(net1(x)))."""
    B = x.shape[0]
    xf = x.reshape(-1).astype(jnp.float32)

    # Lane-dense relayout: batch -> (rows, 128); rows = grid_steps * tile_rows.
    rows_needed = pl.cdiv(B, LANES)
    tile_rows, grid_steps = _choose_tiling(rows_needed, max_tile_rows, target_grid_steps)
    rows = grid_steps * tile_rows
    padded = rows * LANES

    if padded != B:
        # TODO(synk): for ragged B a masked last-tile store (B passed via SMEM) would
        # avoid this extra pad + slice HBM pass; aligned batches skip it entirely.
        xf = jnp.pad(xf, (0, padded - B))
    x2d = xf.reshape(rows, LANES)

    smem_spec = pl.BlockSpec(memory_space=pltpu.MemorySpace.SMEM)
    cost = pl.CostEstimate(flops=51 * padded, transcendentals=0, bytes_accessed=8 * padded)

    out2d = pl.pallas_call(
        mlp_kernel,
        out_shape=jax.ShapeDtypeStruct((rows, LANES), jnp.float32),
        grid=(grid_steps,),
        in_specs=[
            pl.BlockSpec((tile_rows, LANES), lambda i: (i, 0)),  # streamed batch tiles
            smem_spec, smem_spec, smem_spec, smem_spec,          # 22 scalars in SMEM
        ],
        out_specs=pl.BlockSpec((tile_rows, LANES), lambda i: (i, 0)),
        compiler_params=pltpu.CompilerParams(
            # batch axis is embarrassingly parallel -> lets v7x split it over 2 TCs;
            # neutral on single-TC v5e/v6e.
            dimension_semantics=("parallel",),
        ),
        cost_estimate=cost,
    )(
        x2d,
        w1.reshape(-1).astype(jnp.float32),
        b1.reshape(-1).astype(jnp.float32),
        w2.reshape(-1).astype(jnp.float32),
        b2.reshape(-1).astype(jnp.float32),
    )

    out_flat = out2d.reshape(-1)
    if padded != B:
        out_flat = out_flat[:B]
    return out_flat.reshape(B, 1)


def init_params(key):
    """Deterministic init mimicking nn.Linear's U(-1/sqrt(fan_in), 1/sqrt(fan_in))."""
    k1, k2, k3, k4 = jax.random.split(key, 4)
    in1, hid, out = 1, HIDDEN, 1
    bound1 = 1.0 / jnp.sqrt(jnp.float32(in1))
    bound2 = 1.0 / jnp.sqrt(jnp.float32(hid))
    w1 = jax.random.uniform(k1, (in1, hid), jnp.float32, -bound1, bound1)
    b1 = jax.random.uniform(k2, (1, hid), jnp.float32, -bound1, bound1)
    w2 = jax.random.uniform(k3, (hid, out), jnp.float32, -bound2, bound2)
    b2 = jax.random.uniform(k4, (1, out), jnp.float32, -bound2, bound2)
    return w1, b1, w2, b2


if __name__ == "__main__":
    key = jax.random.PRNGKey(0)
    kx, kp = jax.random.split(key)

    batch = 8
    x = jax.random.normal(kx, (batch, 1), jnp.float32)
    w1, b1, w2, b2 = init_params(kp)

    out = toy_model_forward(x, w1, b1, w2, b2)
    out = jax.block_until_ready(out)

    # Pure-JAX reference for correctness.
    ref = jnp.maximum(x @ w1 + b1, 0.0) @ w2 + b2
    assert out.shape == (batch, 1)
    assert jnp.allclose(out, ref, atol=1e-5, rtol=1e-5)

    print("KERNEL_OK")
</pallas_src>

<mosaic_0001>
module attributes {stable_mosaic.version = 11 : i64} {
  func.func @mlp_kernel(%arg0: i32, %arg1: memref<8x128xf32, #tpu.memory_space<vmem>>, %arg2: memref<10xf32, #tpu.memory_space<smem>>, %arg3: memref<10xf32, #tpu.memory_space<smem>>, %arg4: memref<10xf32, #tpu.memory_space<smem>>, %arg5: memref<1xf32, #tpu.memory_space<smem>>, %arg6: memref<8x128xf32, #tpu.memory_space<vmem>>) attributes {dimension_semantics = [#tpu.dimension_semantics<parallel>], iteration_bounds = array<i64: 1>, scalar_prefetch = 0 : i64, scratch_operands = 0 : i64, tpu.core_type = #tpu.core_type<tc>, window_params = [{transform_indices = @transform_0, window_bounds = array<i64: 8, 128>}, {transform_indices = @transform_1, window_bounds = array<i64: 10>}, {transform_indices = @transform_2, window_bounds = array<i64: 10>}, {transform_indices = @transform_3, window_bounds = array<i64: 10>}, {transform_indices = @transform_4, window_bounds = array<i64: 1>}, {transform_indices = @transform_5, window_bounds = array<i64: 8, 128>}]} {
    %c0 = arith.constant 0 : index
    %c0_0 = arith.constant 0 : index
    %0 = vector.load %arg1[%c0, %c0_0] : memref<8x128xf32, #tpu.memory_space<vmem>>, vector<8x128xf32>
    %c0_1 = arith.constant 0 : index
    %1 = memref.load %arg5[%c0_1] : memref<1xf32, #tpu.memory_space<smem>>
    %2 = vector.broadcast %1 : f32 to vector<8x128xf32>
    %c0_2 = arith.constant 0 : index
    %3 = memref.load %arg2[%c0_2] : memref<10xf32, #tpu.memory_space<smem>>
    %4 = vector.broadcast %3 : f32 to vector<8x128xf32>
    %5 = arith.mulf %0, %4 : vector<8x128xf32>
    %c0_3 = arith.constant 0 : index
    %6 = memref.load %arg3[%c0_3] : memref<10xf32, #tpu.memory_space<smem>>
    %7 = vector.broadcast %6 : f32 to vector<8x128xf32>
    %8 = arith.addf %5, %7 : vector<8x128xf32>
    %cst = arith.constant 0.000000e+00 : f32
    %9 = vector.broadcast %cst : f32 to vector<8x128xf32>
    %10 = arith.maximumf %8, %9 : vector<8x128xf32>
    %c0_4 = arith.constant 0 : index
    %11 = memref.load %arg4[%c0_4] : memref<10xf32, #tpu.memory_space<smem>>
    %12 = vector.broadcast %11 : f32 to vector<8x128xf32>
    %13 = arith.mulf %10, %12 : vector<8x128xf32>
    %14 = arith.addf %2, %13 : vector<8x128xf32>
    %c1 = arith.constant 1 : index
    %15 = memref.load %arg2[%c1] : memref<10xf32, #tpu.memory_space<smem>>
    %16 = vector.broadcast %15 : f32 to vector<8x128xf32>
    %17 = arith.mulf %0, %16 : vector<8x128xf32>
    %c1_5 = arith.constant 1 : index
    %18 = memref.load %arg3[%c1_5] : memref<10xf32, #tpu.memory_space<smem>>
    %19 = vector.broadcast %18 : f32 to vector<8x128xf32>
    %20 = arith.addf %17, %19 : vector<8x128xf32>
    %cst_6 = arith.constant 0.000000e+00 : f32
    %21 = vector.broadcast %cst_6 : f32 to vector<8x128xf32>
    %22 = arith.maximumf %20, %21 : vector<8x128xf32>
    %c1_7 = arith.constant 1 : index
    %23 = memref.load %arg4[%c1_7] : memref<10xf32, #tpu.memory_space<smem>>
    %24 = vector.broadcast %23 : f32 to vector<8x128xf32>
    %25 = arith.mulf %22, %24 : vector<8x128xf32>
    %26 = arith.addf %14, %25 : vector<8x128xf32>
    %c2 = arith.constant 2 : index
    %27 = memref.load %arg2[%c2] : memref<10xf32, #tpu.memory_space<smem>>
    %28 = vector.broadcast %27 : f32 to vector<8x128xf32>
    %29 = arith.mulf %0, %28 : vector<8x128xf32>
    %c2_8 = arith.constant 2 : index
    %30 = memref.load %arg3[%c2_8] : memref<10xf32, #tpu.memory_space<smem>>
    %31 = vector.broadcast %30 : f32 to vector<8x128xf32>
    %32 = arith.addf %29, %31 : vector<8x128xf32>
    %cst_9 = arith.constant 0.000000e+00 : f32
    %33 = vector.broadcast %cst_9 : f32 to vector<8x128xf32>
    %34 = arith.maximumf %32, %33 : vector<8x128xf32>
    %c2_10 = arith.constant 2 : index
    %35 = memref.load %arg4[%c2_10] : memref<10xf32, #tpu.memory_space<smem>>
    %36 = vector.broadcast %35 : f32 to vector<8x128xf32>
    %37 = arith.mulf %34, %36 : vector<8x128xf32>
    %38 = arith.addf %26, %37 : vector<8x128xf32>
    %c3 = arith.constant 3 : index
    %39 = memref.load %arg2[%c3] : memref<10xf32, #tpu.memory_space<smem>>
    %40 = vector.broadcast %39 : f32 to vector<8x128xf32>
    %41 = arith.mulf %0, %40 : vector<8x128xf32>
    %c3_11 = arith.constant 3 : index
    %42 = memref.load %arg3[%c3_11] : memref<10xf32, #tpu.memory_space<smem>>
    %43 = vector.broadcast %42 : f32 to vector<8x128xf32>
    %44 = arith.addf %41, %43 : vector<8x128xf32>
    %cst_12 = arith.constant 0.000000e+00 : f32
    %45 = vector.broadcast %cst_12 : f32 to vector<8x128xf32>
    %46 = arith.maximumf %44, %45 : vector<8x128xf32>
    %c3_13 = arith.constant 3 : index
    %47 = memref.load %arg4[%c3_13] : memref<10xf32, #tpu.memory_space<smem>>
    %48 = vector.broadcast %47 : f32 to vector<8x128xf32>
    %49 = arith.mulf %46, %48 : vector<8x128xf32>
    %50 = arith.addf %38, %49 : vector<8x128xf32>
    %c4 = arith.constant 4 : index
    %51 = memref.load %arg2[%c4] : memref<10xf32, #tpu.memory_space<smem>>
    %52 = vector.broadcast %51 : f32 to vector<8x128xf32>
    %53 = arith.mulf %0, %52 : vector<8x128xf32>
    %c4_14 = arith.constant 4 : index
    %54 = memref.load %arg3[%c4_14] : memref<10xf32, #tpu.memory_space<smem>>
    %55 = vector.broadcast %54 : f32 to vector<8x128xf32>
    %56 = arith.addf %53, %55 : vector<8x128xf32>
    %cst_15 = arith.constant 0.000000e+00 : f32
    %57 = vector.broadcast %cst_15 : f32 to vector<8x128xf32>
    %58 = arith.maximumf %56, %57 : vector<8x128xf32>
    %c4_16 = arith.constant 4 : index
    %59 = memref.load %arg4[%c4_16] : memref<10xf32, #tpu.memory_space<smem>>
    %60 = vector.broadcast %59 : f32 to vector<8x128xf32>
    %61 = arith.mulf %58, %60 : vector<8x128xf32>
    %62 = arith.addf %50, %61 : vector<8x128xf32>
    %c5 = arith.constant 5 : index
    %63 = memref.load %arg2[%c5] : memref<10xf32, #tpu.memory_space<smem>>
    %64 = vector.broadcast %63 : f32 to vector<8x128xf32>
    %65 = arith.mulf %0, %64 : vector<8x128xf32>
    %c5_17 = arith.constant 5 : index
    %66 = memref.load %arg3[%c5_17] : memref<10xf32, #tpu.memory_space<smem>>
    %67 = vector.broadcast %66 : f32 to vector<8x128xf32>
    %68 = arith.addf %65, %67 : vector<8x128xf32>
    %cst_18 = arith.constant 0.000000e+00 : f32
    %69 = vector.broadcast %cst_18 : f32 to vector<8x128xf32>
    %70 = arith.maximumf %68, %69 : vector<8x128xf32>
    %c5_19 = arith.constant 5 : index
    %71 = memref.load %arg4[%c5_19] : memref<10xf32, #tpu.memory_space<smem>>
    %72 = vector.broadcast %71 : f32 to vector<8x128xf32>
    %73 = arith.mulf %70, %72 : vector<8x128xf32>
    %74 = arith.addf %62, %73 : vector<8x128xf32>
    %c6 = arith.constant 6 : index
    %75 = memref.load %arg2[%c6] : memref<10xf32, #tpu.memory_space<smem>>
    %76 = vector.broadcast %75 : f32 to vector<8x128xf32>
    %77 = arith.mulf %0, %76 : vector<8x128xf32>
    %c6_20 = arith.constant 6 : index
    %78 = memref.load %arg3[%c6_20] : memref<10xf32, #tpu.memory_space<smem>>
    %79 = vector.broadcast %78 : f32 to vector<8x128xf32>
    %80 = arith.addf %77, %79 : vector<8x128xf32>
    %cst_21 = arith.constant 0.000000e+00 : f32
    %81 = vector.broadcast %cst_21 : f32 to vector<8x128xf32>
    %82 = arith.maximumf %80, %81 : vector<8x128xf32>
    %c6_22 = arith.constant 6 : index
    %83 = memref.load %arg4[%c6_22] : memref<10xf32, #tpu.memory_space<smem>>
    %84 = vector.broadcast %83 : f32 to vector<8x128xf32>
    %85 = arith.mulf %82, %84 : vector<8x128xf32>
    %86 = arith.addf %74, %85 : vector<8x128xf32>
    %c7 = arith.constant 7 : index
    %87 = memref.load %arg2[%c7] : memref<10xf32, #tpu.memory_space<smem>>
    %88 = vector.broadcast %87 : f32 to vector<8x128xf32>
    %89 = arith.mulf %0, %88 : vector<8x128xf32>
    %c7_23 = arith.constant 7 : index
    %90 = memref.load %arg3[%c7_23] : memref<10xf32, #tpu.memory_space<smem>>
    %91 = vector.broadcast %90 : f32 to vector<8x128xf32>
    %92 = arith.addf %89, %91 : vector<8x128xf32>
    %cst_24 = arith.constant 0.000000e+00 : f32
    %93 = vector.broadcast %cst_24 : f32 to vector<8x128xf32>
    %94 = arith.maximumf %92, %93 : vector<8x128xf32>
    %c7_25 = arith.constant 7 : index
    %95 = memref.load %arg4[%c7_25] : memref<10xf32, #tpu.memory_space<smem>>
    %96 = vector.broadcast %95 : f32 to vector<8x128xf32>
    %97 = arith.mulf %94, %96 : vector<8x128xf32>
    %98 = arith.addf %86, %97 : vector<8x128xf32>
    %c8 = arith.constant 8 : index
    %99 = memref.load %arg2[%c8] : memref<10xf32, #tpu.memory_space<smem>>
    %100 = vector.broadcast %99 : f32 to vector<8x128xf32>
    %101 = arith.mulf %0, %100 : vector<8x128xf32>
    %c8_26 = arith.constant 8 : index
    %102 = memref.load %arg3[%c8_26] : memref<10xf32, #tpu.memory_space<smem>>
    %103 = vector.broadcast %102 : f32 to vector<8x128xf32>
    %104 = arith.addf %101, %103 : vector<8x128xf32>
    %cst_27 = arith.constant 0.000000e+00 : f32
    %105 = vector.broadcast %cst_27 : f32 to vector<8x128xf32>
    %106 = arith.maximumf %104, %105 : vector<8x128xf32>
    %c8_28 = arith.constant 8 : index
    %107 = memref.load %arg4[%c8_28] : memref<10xf32, #tpu.memory_space<smem>>
    %108 = vector.broadcast %107 : f32 to vector<8x128xf32>
    %109 = arith.mulf %106, %108 : vector<8x128xf32>
    %110 = arith.addf %98, %109 : vector<8x128xf32>
    %c9 = arith.constant 9 : index
    %111 = memref.load %arg2[%c9] : memref<10xf32, #tpu.memory_space<smem>>
    %112 = vector.broadcast %111 : f32 to vector<8x128xf32>
    %113 = arith.mulf %0, %112 : vector<8x128xf32>
    %c9_29 = arith.constant 9 : index
    %114 = memref.load %arg3[%c9_29] : memref<10xf32, #tpu.memory_space<smem>>
    %115 = vector.broadcast %114 : f32 to vector<8x128xf32>
    %116 = arith.addf %113, %115 : vector<8x128xf32>
    %cst_30 = arith.constant 0.000000e+00 : f32
    %117 = vector.broadcast %cst_30 : f32 to vector<8x128xf32>
    %118 = arith.maximumf %116, %117 : vector<8x128xf32>
    %c9_31 = arith.constant 9 : index
    %119 = memref.load %arg4[%c9_31] : memref<10xf32, #tpu.memory_space<smem>>
    %120 = vector.broadcast %119 : f32 to vector<8x128xf32>
    %121 = arith.mulf %118, %120 : vector<8x128xf32>
    %122 = arith.addf %110, %121 : vector<8x128xf32>
    %c0_32 = arith.constant 0 : index
    %c0_33 = arith.constant 0 : index
    %123 = vector.load %arg6[%c0_32, %c0_33] : memref<8x128xf32, #tpu.memory_space<vmem>>, vector<8x128xf32>
    tpu.vector_store %arg6[%c0_32, %c0_33], %122 {strides = array<i32>} : memref<8x128xf32, #tpu.memory_space<vmem>>, vector<8x128xf32>,
    return
  }
  func.func @transform_0(%arg0: i32) -> (i32, i32) {
    %c0_i32 = arith.constant 0 : i32
    %c0_i32_0 = arith.constant 0 : i32
    return %arg0, %c0_i32 : i32, i32
  }
  func.func @transform_1(%arg0: i32) -> i32 {
    %c0_i32 = arith.constant 0 : i32
    %c0_i32_0 = arith.constant 0 : i32
    return %c0_i32 : i32
  }
  func.func @transform_2(%arg0: i32) -> i32 {
    %c0_i32 = arith.constant 0 : i32
    %c0_i32_0 = arith.constant 0 : i32
    return %c0_i32 : i32
  }
  func.func @transform_3(%arg0: i32) -> i32 {
    %c0_i32 = arith.constant 0 : i32
    %c0_i32_0 = arith.constant 0 : i32
    return %c0_i32 : i32
  }
  func.func @transform_4(%arg0: i32) -> i32 {
    %c0_i32 = arith.constant 0 : i32
    %c0_i32_0 = arith.constant 0 : i32
    return %c0_i32 : i32
  }
  func.func @transform_5(%arg0: i32) -> (i32, i32) {
    %c0_i32 = arith.constant 0 : i32
    %c0_i32_0 = arith.constant 0 : i32
    return %arg0, %c0_i32 : i32, i32
  }
}

</mosaic_0001>

<bundles_post_ra>
// kernel: tpu_custom_call.1
= control target key start
LH: loop header
LB: loop body
LE: loop exit
PB: predicated region body
PF: predicated region fallthrough
CT: control target
= control target key end

     0   :  { %11 = vsyncpa [#allocation4], 0  ;;  %s415_s0 = inlined_call_operand.hbm [shape: f32[8,128], index: 0, kind: input, shape index: {}]   ;;  %s416_s1 = inlined_call_operand.vmem [shape: f32[10], index: 1, kind: input, shape index: {}]   ;;  %s417_s2 = inlined_call_operand.vmem [shape: f32[10], index: 2, kind: input, shape index: {}]   ;;  %s418_s3 = inlined_call_operand.vmem [shape: f32[10], index: 3, kind: input, shape index: {}]   ;;  %s419_s4 = inlined_call_operand.<no memory space> [shape: f32[1], index: 4, kind: input, shape index: {}]   ;;  %s420_s5 = inlined_call_operand.hbm [shape: f32[8,128], index: 5, kind: output, shape index: {}]  }
   0x1   :  { %12 = vsyncpa [#allocation6], 0 }
   0x2   :  { %13 = vsyncpa [#allocation9], 0  ;;  %s40_s20 = sshll.u32 %s417_s2, 4  ;;  %s41_s20 = int_to_ptr.vmem [resolvable:$true] %s40_s20 }
   0x3   :  { %14 = vsyncpa [#allocation5], 0  ;;  %s20_s23 = sshll.u32 %s415_s0, 4  ;;  %s329_s24 = smov [#allocation8]   ;;  %s21_s23 = int_to_ptr.hbm [resolvable:$true] %s20_s23 }
   0x4   :  { %43 = dma.vmem_to_smem %s41_s20, 16, %s329_s24, [#allocation9]  }
   0x5   :  { %s330_s25 = smov [#allocation3]   ;;  %s31_s29 = sshll.u32 %s416_s1, 4  ;;  %s32_s29 = int_to_ptr.vmem [resolvable:$true] %s31_s29 }
   0x6   :  { %s22_s26 = sshll.u32 %s330_s25, 4  ;;  %s49_s6 = sshll.u32 %s418_s3, 4  ;;  %s23_s26 = int_to_ptr.vmem [resolvable:$true] %s22_s26  ;;  %s50_s6 = int_to_ptr.vmem [resolvable:$true] %s49_s6 }
   0x7   :  { %25 = dma.hbm_to_vmem [thread:$0]  %s21_s23, 128, %s23_s26, [#allocation4]  }
   0x8   :  { %s331_s7 = smov [#allocation7]   ;;  %s332_s0 = smov [#allocation10]  }
   0x9   :  { %34 = dma.vmem_to_smem %s32_s29, 16, %s331_s7, [#allocation6]  }
   0xa   :  { %52 = dma.vmem_to_smem %s50_s6, 16, %s332_s0, [#allocation9]  }
   0xb   :  { %321 = dma.done.wait [#allocation4], 128  }
   0xc   :  { %322 = vsyncadd [#allocation4], 4294967168 }
   0xd   :  { %323 = dma.done.wait [#allocation6], 16  }
   0xe   :  { %324 = vsyncadd [#allocation6], 4294967280 }
   0xf   :  { %325 = dma.done.wait [#allocation9], 32  }
  0x10   :  { %326 = vsyncadd [#allocation9], 4294967264 }
  0x11   :  { %71 = sfence }
  0x12   :  { %s75_s1 = sld [smem:[#allocation7]]  ;;  %v376_v0 = vld [vmem:[#allocation3] sm:$0xff]  ;;  %v74_v10 = vstv %s419_s4 }
  0x13   :  { %s78_s8 = sld [smem:[#allocation8]] }
  0x14   :  { %s82_s9 = sld [smem:[#allocation10]] }
  0x15   :  { %s205_s10 = sld [smem:[#allocation7 + $0x1]] }
  0x16   :  { %s206_s11 = sld [smem:[#allocation8 + $0x1]] }
  0x17   :  { %s378_s3 = sld [smem:[#allocation10 + $0x1]] }
  0x18   :  { %v76_v1 = vstv %s75_s1  ;;  %s208_s12 = sld [smem:[#allocation7 + $0x2]] }
  0x19   :  { %v77_v2 = vmul.f32 %v76_v1, %v376_v0  ;;  %v79_v3 = vstv %s78_s8  ;;  %s209_s13 = sld [smem:[#allocation8 + $0x2]] }
  0x1a   :  { %s381_s14 = sld [smem:[#allocation10 + $0x2]]  ;;  %v83_v6 = vstv %s82_s9  ;;  %s333_s9 = smov [#allocation11]  }
  0x1b   :  { %v80_v4 = vadd.f32 %v79_v3, %v77_v2  ;;  %v87_v5 = vstv %s205_s10  ;;  %s211_s15 = sld [smem:[#allocation7 + $0x3]]  ;;  %s191_s10 = sshll.u32 %s333_s9, 4  ;;  %s192_s10 = int_to_ptr.vmem [resolvable:$true] %s191_s10 }
  0x1c   :  { %v88_v7 = vmul.f32 %v87_v5, %v376_v0  ;;  %v90_v8 = vstv %s206_s11  ;;  %s212_s16 = sld [smem:[#allocation8 + $0x3]] }
  0x1d   :  { %v81_v9 = vmax.f32 %v80_v4, 0.0  ;;  %s384_s17 = sld [smem:[#allocation10 + $0x3]]  ;;  %v94_v14 = vstv %s378_s3 }
  0x1e   :  { %v91_v11 = vadd.f32 %v90_v8, %v88_v7  ;;  %v98_v12 = vstv %s208_s12  ;;  %s214_s20 = sld [smem:[#allocation7 + $0x4]]  ;;  %s193_s12 = sshll.u32 %s420_s5, 4  ;;  %s194_s12 = int_to_ptr.hbm [resolvable:$true] %s193_s12 }
  0x1f   :  { %v84_v13 = vmul.f32 %v83_v6, %v81_v9  ;;  %v99_v15 = vmul.f32 %v98_v12, %v376_v0  ;;  %v101_v16 = vstv %s209_s13  ;;  %s215_s21 = sld [smem:[#allocation8 + $0x4]] }
  0x20   :  { %v92_v17 = vmax.f32 %v91_v11, 0.0  ;;  %s391_s22 = sld [smem:[#allocation10 + $0x4]]  ;;  %v105_v22 = vstv %s381_s14 }
  0x21   :  { %v85_v18 = vadd.f32 %v84_v13, %v74_v10  ;;  %v102_v19 = vadd.f32 %v101_v16, %v99_v15  ;;  %v109_v20 = vstv %s211_s15  ;;  %s217_s23 = sld [smem:[#allocation7 + $0x5]] }
  0x22   :  { %v95_v21 = vmul.f32 %v94_v14, %v92_v17  ;;  %v110_v23 = vmul.f32 %v109_v20, %v376_v0  ;;  %v112_v24 = vstv %s212_s16  ;;  %s218_s4 = sld [smem:[#allocation8 + $0x5]] }
  0x23   :  { %v103_v25 = vmax.f32 %v102_v19, 0.0  ;;  %s395_s24 = sld [smem:[#allocation10 + $0x5]]  ;;  %v116_v30 = vstv %s384_s17 }
  0x24   :  { %v96_v26 = vadd.f32 %v95_v21, %v85_v18  ;;  %v113_v27 = vadd.f32 %v112_v24, %v110_v23  ;;  %v120_v28 = vstv %s214_s20  ;;  %s220_s25 = sld [smem:[#allocation7 + $0x6]] }
  0x25   :  { %v106_v29 = vmul.f32 %v105_v22, %v103_v25  ;;  %v121_v31 = vmul.f32 %v120_v28, %v376_v0  ;;  %v123_v32 = vstv %s215_s21  ;;  %s221_s26 = sld [smem:[#allocation8 + $0x6]] }
  0x26   :  { %v114_v33 = vmax.f32 %v113_v27, 0.0  ;;  %s399_s27 = sld [smem:[#allocation10 + $0x6]]  ;;  %v127_v38 = vstv %s391_s22 }
  0x27   :  { %v107_v34 = vadd.f32 %v106_v29, %v96_v26  ;;  %v124_v35 = vadd.f32 %v123_v32, %v121_v31  ;;  %v131_v36 = vstv %s217_s23  ;;  %s223_s28 = sld [smem:[#allocation7 + $0x7]] }
  0x28   :  { %v117_v37 = vmul.f32 %v116_v30, %v114_v33  ;;  %v132_v39 = vmul.f32 %v131_v36, %v376_v0  ;;  %v134_v40 = vstv %s218_s4  ;;  %s224_s29 = sld [smem:[#allocation8 + $0x7]] }
  0x29   :  { %v125_v41 = vmax.f32 %v124_v35, 0.0  ;;  %s403_s30 = sld [smem:[#allocation10 + $0x7]]  ;;  %v138_v46 = vstv %s395_s24 }
  0x2a   :  { %v118_v42 = vadd.f32 %v117_v37, %v107_v34  ;;  %v135_v43 = vadd.f32 %v134_v40, %v132_v39  ;;  %v142_v44 = vstv %s220_s25  ;;  %s226_s2 = sld [smem:[#allocation7 + $0x8]] }
  0x2b   :  { %v128_v45 = vmul.f32 %v127_v38, %v125_v41  ;;  %v143_v47 = vmul.f32 %v142_v44, %v376_v0  ;;  %v145_v48 = vstv %s221_s26  ;;  %s227_s6 = sld [smem:[#allocation8 + $0x8]] }
  0x2c   :  { %v136_v49 = vmax.f32 %v135_v43, 0.0  ;;  %s228_s7 = sld [smem:[#allocation10 + $0x8]]  ;;  %v149_v54 = vstv %s399_s27 }
  0x2d   :  { %v129_v50 = vadd.f32 %v128_v45, %v118_v42  ;;  %v146_v51 = vadd.f32 %v145_v48, %v143_v47  ;;  %v153_v52 = vstv %s223_s28  ;;  %s229_s0 = sld [smem:[#allocation7 + $0x9]] }
  0x2e   :  { %v139_v53 = vmul.f32 %v138_v46, %v136_v49  ;;  %v154_v55 = vmul.f32 %v153_v52, %v376_v0  ;;  %v156_v56 = vstv %s224_s29  ;;  %s230_s1 = sld [smem:[#allocation8 + $0x9]] }
  0x2f   :  { %v147_v57 = vmax.f32 %v146_v51, 0.0  ;;  %s231_s8 = sld [smem:[#allocation10 + $0x9]]  ;;  %v160_v62 = vstv %s403_s30 }
  0x30   :  { %v140_v58 = vadd.f32 %v139_v53, %v129_v50  ;;  %v157_v59 = vadd.f32 %v156_v56, %v154_v55  ;;  %v164_v60 = vstv %s226_s2 }
  0x31   :  { %v150_v61 = vmul.f32 %v149_v54, %v147_v57  ;;  %v165_v63 = vmul.f32 %v164_v60, %v376_v0  ;;  %v167_v1 = vstv %s227_s6 }
  0x32   :  { %v158_v2 = vmax.f32 %v157_v59, 0.0  ;;  %v171_v7 = vstv %s228_s7 }
  0x33   :  { %v151_v3 = vadd.f32 %v150_v61, %v140_v58  ;;  %v168_v4 = vadd.f32 %v167_v1, %v165_v63  ;;  %v175_v5 = vstv %s229_s0 }
  0x34   :  { %v161_v6 = vmul.f32 %v160_v62, %v158_v2  ;;  %v176_v8 = vmul.f32 %v175_v5, %v376_v0  ;;  %v178_v9 = vstv %s230_s1 }
  0x35   :  { %v169_v10 = vmax.f32 %v168_v4, 0.0  ;;  %v182_v14 = vstv %s231_s8 }
  0x36   :  { %v162_v11 = vadd.f32 %v161_v6, %v151_v3  ;;  %v179_v12 = vadd.f32 %v178_v9, %v176_v8 }
  0x37   :  { %v172_v13 = vmul.f32 %v171_v7, %v169_v10 }
  0x38   :  { %v180_v15 = vmax.f32 %v179_v12, 0.0 }
  0x39   :  { %v173_v16 = vadd.f32 %v172_v13, %v162_v11 }
  0x3a   :  { %v183_v17 = vmul.f32 %v182_v14, %v180_v15 }
  0x3c   :  { %v184_v18 = vadd.f32 %v183_v17, %v173_v16 }
  0x3e   :  { %185 = vst [vmem:[#allocation11] sm:$0xff] %v184_v18 }
  0x3f   :  { %196 = dma.vmem_to_hbm [thread:$0]  %s192_s10, 128, %s194_s12, [#allocation5]  }
  0x40   :  { %327 = dma.done.wait [#allocation5], 128  }
  0x41   :  { %328 = vsyncadd [#allocation5], 4294967168 }
  0x42   :  { %201 = vsyncpa [#allocation4], 1 }
  0x43   :  { %202 = vsyncpa [#allocation5], 1 }
  0x44   :  { %203 = vsyncpa [#allocation6], 1 }
  0x45   :  { %204 = vsyncpa [#allocation9], 1 }

</bundles_post_ra>
